<compile_context>
chip_gen: v6e
topology: v6e:2x2x1
jax: 0.10.0
libtpu: 0.0.40
codegen_flags: <defaults>
</compile_context>

<pallas_src>
import functools

import numpy as np
import jax
import jax.numpy as jnp
from jax import lax
from jax.experimental import pallas as pl
from jax.experimental.pallas import tpu as pltpu

LANE = 128                       # vreg lane width
SUBLANE = 8                      # vreg sublane height
MAX_TILE_ROWS = 4096             # 4096*128*4 B = 2 MiB per buffer
FAST_PATH_MAX_BYTES = 4 * 1024 * 1024   # VMEM-resident single-pass threshold
SHIFT = np.float32(2.0 ** 31)

_PHI = np.uint32(0x9E3779B9)
_SALTS = (np.uint32(0x85EBCA6B), np.uint32(0xC2B2AE35),
          np.uint32(0x27D4EB2F), np.uint32(0x165667B1))


def _round_up(v, m):
    return (v + m - 1) // m * m


# --------------------- portable VPU-only noise helpers --------------------- #

def _hash_u32(v):
    """murmur3-style 32-bit finalizer (xor-shift-multiply), uint32 in/out."""
    v = v ^ (v >> np.uint32(16))
    v = v * np.uint32(0x7FEB352D)
    v = v ^ (v >> np.uint32(15))
    v = v * np.uint32(0x846CA68B)
    v = v ^ (v >> np.uint32(16))
    return v


def _uniform01(v):
    """uint32 -> uniform float32 in [0,1) using the top 24 bits."""
    h = (_hash_u32(v) >> np.uint32(8)).astype(jnp.int32)   # < 2**24, exact
    return h.astype(jnp.float32) * np.float32(2.0 ** -24)


def _gauss_clt4(idx_u32, seed_u32):
    """Approx N(0,1): sum of 4 hashed uniforms (Irwin-Hall), VPU-only."""
    mixed = idx_u32 ^ (seed_u32 * _PHI)
    u = _uniform01(mixed ^ _SALTS[0])
    for s in _SALTS[1:]:
        u = u + _uniform01(mixed ^ s)
    return (u - np.float32(2.0)) * np.float32(np.sqrt(3.0))


# ------------------------------- kernels ----------------------------------- #

def _absmax_kernel(x_ref, o_ref, *, tile_rows, total_rows, mask_tail):
    """Per-tile partial max(|x|): (tile_rows,128) -> (8,128) via VPU maxima."""
    a = jnp.abs(x_ref[...])
    if mask_tail:
        # Ragged final tile: rows >= total_rows hold garbage -> mask to 0.
        r = (pl.program_id(0) * tile_rows
             + lax.broadcasted_iota(jnp.int32, a.shape, 0))
        a = jnp.where(r < total_rows, a, np.float32(0.0))
    o_ref[...] = jnp.max(a.reshape(-1, SUBLANE, LANE), axis=0)


def _quant_kernel(scal_ref, x_ref, o_ref):
    """Tiled amp == 0 path: pure fixed-point quantization."""
    q = scal_ref[0]              # 2**(31 - e)
    out_scale = scal_ref[1]      # 2**(e - 31)
    o_ref[...] = jnp.round(jnp.clip(x_ref[...] * q, -SHIFT, SHIFT)) * out_scale


def _quant_noise_kernel(scal_ref, seed_ref, x_ref, o_ref, *, tile_rows):
    """Tiled amp != 0 path: quantization + in-kernel hash-based noise."""
    q = scal_ref[0]
    out_scale = scal_ref[1]
    noise_scale = scal_ref[2]    # amp * 2**15 * out_scale (pre-folded)
    shape = x_ref.shape
    r = lax.broadcasted_iota(jnp.int32, shape, 0)
    c = lax.broadcasted_iota(jnp.int32, shape, 1)
    idx = ((pl.program_id(0) * tile_rows + r) * LANE + c).astype(jnp.uint32)
    noise = _gauss_clt4(idx, seed_ref[0].astype(jnp.uint32))
    out_int = jnp.round(jnp.clip(x_ref[...] * q, -SHIFT, SHIFT))
    o_ref[...] = out_int * out_scale + noise * noise_scale


def _fused_scales(x):
    """In-kernel scalar glue: abs-max -> (q, out_scale, e), all (1,1) f32."""
    a = jnp.abs(x)
    m = jnp.max(jnp.max(a, axis=1, keepdims=True), axis=0, keepdims=True)
    m = jnp.maximum(m, np.float32(np.finfo(np.float32).tiny))
    e = jnp.ceil(jnp.log2(m))
    q = jnp.exp2(np.float32(31.0) - e)
    out_scale = jnp.exp2(e - np.float32(31.0))
    return q, out_scale, e


def _fused_kernel(x_ref, o_ref):
    """VMEM-resident single-pass path, amp == 0."""
    x = x_ref[...]
    q, out_scale, _ = _fused_scales(x)
    o_ref[...] = jnp.round(jnp.clip(x * q, -SHIFT, SHIFT)) * out_scale


def _fused_noise_kernel(seed_ref, x_ref, o_ref, *, amp):
    """VMEM-resident single-pass path, amp != 0."""
    x = x_ref[...]
    q, out_scale, e = _fused_scales(x)
    noise_scale = np.float32(amp) * jnp.exp2(e - np.float32(16.0))
    r = lax.broadcasted_iota(jnp.int32, x.shape, 0)
    c = lax.broadcasted_iota(jnp.int32, x.shape, 1)
    idx = (r * LANE + c).astype(jnp.uint32)
    noise = _gauss_clt4(idx, seed_ref[0].astype(jnp.uint32))
    out_int = jnp.round(jnp.clip(x * q, -SHIFT, SHIFT))
    o_ref[...] = out_int * out_scale + noise * noise_scale


# ------------------------------- wrapper ------------------------------------ #

def torch_quant_noise(x, amp=0.0, noise_seed=0, *,
                      max_tile_rows=MAX_TILE_ROWS,
                      fast_path_max_bytes=FAST_PATH_MAX_BYTES):
    # NOTE: like torch.randn_like, fresh noise per call requires varying
    # noise_seed per call; a fixed seed reproduces the same noise.
    x = x.astype(jnp.float32)
    orig_shape = x.shape
    n = x.size
    rows = pl.cdiv(n, LANE)                        # static python int
    use_noise = (amp != 0.0)                       # amp must be static

    xf = x.reshape(-1)
    pad_cols = rows * LANE - n
    if pad_cols:                                   # only if numel % 128 != 0
        xf = jnp.pad(xf, (0, pad_cols))            # zero pad: abs-max safe
    x2 = xf.reshape(rows, LANE)
    seed = jnp.asarray([noise_seed], dtype=jnp.int32)

    if rows * LANE * 4 <= fast_path_max_bytes and fast_path_max_bytes > 0:
        # ---- single-pass VMEM-resident fast path (2 HBM passes total) ------ #
        full_spec = pl.BlockSpec((rows, LANE), lambda i: (0, 0))
        cp = pltpu.CompilerParams(vmem_limit_bytes=32 * 1024 * 1024)
        if use_noise:
            out2 = pl.pallas_call(
                functools.partial(_fused_noise_kernel, amp=float(amp)),
                out_shape=jax.ShapeDtypeStruct((rows, LANE), jnp.float32),
                grid=(1,),
                in_specs=[pl.BlockSpec(memory_space=pltpu.SMEM),   # seed
                          full_spec],
                out_specs=full_spec,
                compiler_params=cp,
            )(seed, x2)
        else:
            out2 = pl.pallas_call(
                _fused_kernel,
                out_shape=jax.ShapeDtypeStruct((rows, LANE), jnp.float32),
                grid=(1,),
                in_specs=[full_spec],
                out_specs=full_spec,
                compiler_params=cp,
            )(x2)
    else:
        # ---- tiled two-pass streaming path (large tensors) ----------------- #
        tile_rows = _round_up(min(int(max_tile_rows), _round_up(rows, SUBLANE)),
                              SUBLANE)
        num_tiles = pl.cdiv(rows, tile_rows)
        mask_tail = (rows % tile_rows) != 0
        tile_spec = pl.BlockSpec((tile_rows, LANE), lambda i: (i, 0))

        # pass 1: per-tile partial max(|x|), fully parallel (megacore-friendly)
        partial = pl.pallas_call(
            functools.partial(_absmax_kernel, tile_rows=tile_rows,
                              total_rows=rows, mask_tail=mask_tail),
            out_shape=jax.ShapeDtypeStruct((num_tiles * SUBLANE, LANE),
                                           jnp.float32),
            grid=(num_tiles,),
            in_specs=[tile_spec],
            out_specs=pl.BlockSpec((SUBLANE, LANE), lambda i: (i, 0)),
            compiler_params=pltpu.CompilerParams(
                dimension_semantics=("parallel",)),
        )(x2)
        maxval = jnp.max(partial)                  # tiny final reduce in XLA
        maxval = jnp.maximum(maxval, jnp.float32(np.finfo(np.float32).tiny))
        e = jnp.ceil(jnp.log2(maxval))
        q = jnp.exp2(31.0 - e)                     # 2**(31-e), exact
        out_scale = jnp.exp2(e - 31.0)             # scaling / 2**31
        noise_scale = jnp.float32(amp) * jnp.exp2(e - 16.0)
        scalars = jnp.stack([q, out_scale, noise_scale]).astype(jnp.float32)

        # pass 2: elementwise quantization (hot path)
        if use_noise:
            out2 = pl.pallas_call(
                functools.partial(_quant_noise_kernel, tile_rows=tile_rows),
                out_shape=jax.ShapeDtypeStruct((rows, LANE), jnp.float32),
                grid=(num_tiles,),
                in_specs=[pl.BlockSpec(memory_space=pltpu.SMEM),   # scalars
                          pl.BlockSpec(memory_space=pltpu.SMEM),   # seed
                          tile_spec],
                out_specs=tile_spec,
                compiler_params=pltpu.CompilerParams(
                    dimension_semantics=("parallel",)),
            )(scalars, seed, x2)
        else:
            out2 = pl.pallas_call(
                _quant_kernel,
                out_shape=jax.ShapeDtypeStruct((rows, LANE), jnp.float32),
                grid=(num_tiles,),
                in_specs=[pl.BlockSpec(memory_space=pltpu.SMEM),   # scalars
                          tile_spec],
                out_specs=tile_spec,
                compiler_params=pltpu.CompilerParams(
                    dimension_semantics=("parallel",)),
            )(scalars, x2)

    out_flat = out2.reshape(-1)
    if pad_cols:
        out_flat = out_flat[:n]
    return out_flat.reshape(orig_shape)


# Pure-JAX reference (amp=0 path), faithful to the PyTorch module.
def _reference(x):
    x = x.astype(jnp.float32)
    sign = jnp.sign(x)
    a = jnp.abs(x)
    m = jnp.maximum(jnp.max(a), jnp.float32(np.finfo(np.float32).tiny))
    scaling = jnp.exp2(jnp.ceil(jnp.log2(m)))
    mant = jnp.clip(a / scaling, 0.0, 1.0)
    shift = jnp.float32(2.0 ** 31)
    out_int = jnp.round(mant * shift) * sign
    return out_int * (scaling / shift)


if __name__ == "__main__":
    key = jax.random.PRNGKey(0)
    # Conv-style NCHW activation: batch=2, channels=4, spatial=16x16.
    x = jax.random.normal(key, (2, 4, 16, 16), dtype=jnp.float32) * 3.0
    ref = _reference(x)

    # amp = 0 (module default): fast single-pass VMEM-resident path.
    y0 = jax.block_until_ready(torch_quant_noise(x, amp=0.0))
    assert y0.shape == x.shape and y0.dtype == jnp.float32
    assert jnp.allclose(y0, ref, rtol=1e-6, atol=1e-6), "fast path mismatch"

    # amp = 0: forced tiled two-pass path (multi-tile grid + SMEM scalars).
    y0t = jax.block_until_ready(
        torch_quant_noise(x, amp=0.0, max_tile_rows=8, fast_path_max_bytes=0))
    assert jnp.allclose(y0t, ref, rtol=1e-6, atol=1e-6), "tiled path mismatch"

    # amp != 0: fast path with in-kernel VPU-only noise; tiny, deterministic.
    y1 = jax.block_until_ready(torch_quant_noise(x, amp=0.5, noise_seed=7))
    assert y1.shape == x.shape and bool(jnp.isfinite(y1).all())
    d = jnp.abs(y1 - ref)
    assert float(d.max()) < 1e-2 and float(d.mean()) > 1e-7
    y1b = jax.block_until_ready(torch_quant_noise(x, amp=0.5, noise_seed=7))
    assert jnp.array_equal(y1, y1b), "noise not deterministic for fixed seed"

    # amp != 0: forced tiled path (exercises the tiled noise kernel).
    y1t = jax.block_until_ready(
        torch_quant_noise(x, amp=0.5, noise_seed=7, max_tile_rows=8,
                          fast_path_max_bytes=0))
    assert bool(jnp.isfinite(y1t).all())
    assert float(jnp.abs(y1t - ref).max()) < 1e-2

    # Odd-sized input: lane padding + ragged last tile on the tiled path.
    x_small = jax.random.normal(jax.random.PRNGKey(2), (3, 5, 7, 11),
                                dtype=jnp.float32)
    y2 = jax.block_until_ready(
        torch_quant_noise(x_small, amp=0.0, max_tile_rows=8,
                          fast_path_max_bytes=0))
    assert jnp.allclose(y2, _reference(x_small), rtol=1e-6, atol=1e-6)

    print("KERNEL_OK")
</pallas_src>

<mosaic_0001>
module attributes {stable_mosaic.version = 11 : i64} {
  func.func @_fused_kernel(%arg0: i32, %arg1: memref<16x128xf32, #tpu.memory_space<vmem>>, %arg2: memref<16x128xf32, #tpu.memory_space<vmem>>) attributes {dimension_semantics = [#tpu.dimension_semantics<arbitrary>], iteration_bounds = array<i64: 1>, scalar_prefetch = 0 : i64, scratch_operands = 0 : i64, tpu.core_type = #tpu.core_type<tc>, window_params = [{pipeline_mode = #tpu.pipeline_mode<synchronous>, transform_indices = @transform_0, window_bounds = array<i64: 16, 128>}, {pipeline_mode = #tpu.pipeline_mode<synchronous>, transform_indices = @transform_1, window_bounds = array<i64: 16, 128>}]} {
    %c0 = arith.constant 0 : index
    %c0_0 = arith.constant 0 : index
    %0 = vector.load %arg1[%c0, %c0_0] : memref<16x128xf32, #tpu.memory_space<vmem>>, vector<16x128xf32>
    %1 = math.absf %0 : vector<16x128xf32>
    %cst = arith.constant dense<0xFF800000> : vector<16xf32>
    %2 = vector.multi_reduction <maximumf>, %1, %cst [1] : vector<16x128xf32> to vector<16xf32>
    %3 = vector.shape_cast %2 : vector<16xf32> to vector<16x1xf32>
    %cst_1 = arith.constant dense<0xFF800000> : vector<1xf32>
    %4 = vector.multi_reduction <maximumf>, %3, %cst_1 [0] : vector<16x1xf32> to vector<1xf32>
    %5 = vector.shape_cast %4 : vector<1xf32> to vector<1x1xf32>
    %cst_2 = arith.constant 1.17549435E-38 : f32
    %6 = vector.broadcast %cst_2 : f32 to vector<1x1xf32>
    %7 = arith.maximumf %5, %6 : vector<1x1xf32>
    %8 = math.log %7 : vector<1x1xf32>
    %cst_3 = arith.constant 2.000000e+00 : f32
    %9 = math.log %cst_3 : f32
    %10 = vector.broadcast %9 : f32 to vector<1x1xf32>
    %11 = arith.divf %8, %10 : vector<1x1xf32>
    %12 = math.ceil %11 : vector<1x1xf32>
    %cst_4 = arith.constant 3.100000e+01 : f32
    %13 = vector.broadcast %cst_4 : f32 to vector<1x1xf32>
    %14 = arith.subf %13, %12 : vector<1x1xf32>
    %15 = math.exp2 %14 : vector<1x1xf32>
    %cst_5 = arith.constant 3.100000e+01 : f32
    %16 = vector.broadcast %cst_5 : f32 to vector<1x1xf32>
    %17 = arith.subf %12, %16 : vector<1x1xf32>
    %18 = math.exp2 %17 : vector<1x1xf32>
    %19 = vector.broadcast %15 : vector<1x1xf32> to vector<16x128xf32>
    %20 = arith.mulf %0, %19 : vector<16x128xf32>
    %cst_6 = arith.constant -2.14748365E+9 : f32
    %cst_7 = arith.constant 2.14748365E+9 : f32
    %21 = vector.broadcast %cst_6 : f32 to vector<16x128xf32>
    %22 = arith.maximumf %21, %20 : vector<16x128xf32>
    %23 = vector.broadcast %cst_7 : f32 to vector<16x128xf32>
    %24 = arith.minimumf %23, %22 : vector<16x128xf32>
    %25 = math.roundeven %24 : vector<16x128xf32>
    %26 = vector.broadcast %18 : vector<1x1xf32> to vector<16x128xf32>
    %27 = arith.mulf %25, %26 : vector<16x128xf32>
    %c0_8 = arith.constant 0 : index
    %c0_9 = arith.constant 0 : index
    %28 = vector.load %arg2[%c0_8, %c0_9] : memref<16x128xf32, #tpu.memory_space<vmem>>, vector<16x128xf32>
    tpu.vector_store %arg2[%c0_8, %c0_9], %27 {strides = array<i32>} : memref<16x128xf32, #tpu.memory_space<vmem>>, vector<16x128xf32>,
    return
  }
  func.func @transform_0(%arg0: i32) -> (i32, i32) {
    %c0_i32 = arith.constant 0 : i32
    %c0_i32_0 = arith.constant 0 : i32
    %c0_i32_1 = arith.constant 0 : i32
    return %c0_i32, %c0_i32_0 : i32, i32
  }
  func.func @transform_1(%arg0: i32) -> (i32, i32) {
    %c0_i32 = arith.constant 0 : i32
    %c0_i32_0 = arith.constant 0 : i32
    %c0_i32_1 = arith.constant 0 : i32
    return %c0_i32, %c0_i32_0 : i32, i32
  }
}

</mosaic_0001>

<bundles_post_ra>
// kernel: tpu_custom_call.1
= control target key start
LH: loop header
LB: loop body
LE: loop exit
PB: predicated region body
PF: predicated region fallthrough
CT: control target
= control target key end

     0   :  { %6 = vsyncpa [#allocation3], 0  ;;  %s176_s0 = inlined_call_operand.hbm [shape: f32[16,128], index: 0, kind: input, shape index: {}]   ;;  %s177_s1 = inlined_call_operand.hbm [shape: f32[16,128], index: 1, kind: output, shape index: {}]  }
   0x1   :  { %7 = vsyncpa [#allocation4], 0  ;;  %s150_s6 = smov [#allocation2]  }
   0x2   :  { %s13_s7 = sshll.u32 %s150_s6, 4  ;;  %s14_s7 = int_to_ptr.vmem [resolvable:$true] %s13_s7 }
   0x3   :  { %s114_s8 = scalar_lea.vmem %s14_s7, 256  ;;  %p119_p1 = scmp.lt.s32.totalorder %s14_s7, %s14_s7 }
   0x4   :  { %p115_p0 = scmp.ne.s32.totalorder %s14_s7, %s114_s8  ;;  %p120_p2 = scmp.lt.s32.totalorder %s114_s8, %s114_s8 }
   0x6   :  { %p121_p3 = por %p120_p2, %p119_p1 }
   0x8   :  { %p122_p4 = pnand %p121_p3, %p115_p0 }
   0xa   :  { %125 = shalt.err (!%p122_p4)
}
   0xb   :  { %s151_s9 = smov 128   ;;  %s152_s10 = smov 8  }
   0xc   :  { %19 = dma.hbm_to_vmem [thread:$0]  %s176_s0, 256, %s14_s7, [#allocation3], %s151_s9, %s151_s9, %s152_s10  }
   0xd   :  { %146 = dma.done.wait [#allocation3], 256  }
   0xe   :  { %147 = vsyncadd [#allocation3], 4294967040  ;;  %v23_v0 = vld [vmem:[#allocation2] sm:$0xff]  ;;  %v24_v1 = vld [vmem:[#allocation2 + $0x8] sm:$0xff]  ;;  %s153_s0 = smov [#allocation5]  }
   0xf   :  { %v25_v2 = vand.u32 2147483647, %v23_v0  ;;  %v26_v3 = vand.u32 2147483647, %v24_v1  ;;  %s65_s13 = sshll.u32 %s153_s0, 4  ;;  %s66_s13 = int_to_ptr.vmem [resolvable:$true] %s65_s13 }
  0x10   :  { %s126_s14 = scalar_lea.vmem %s66_s13, 256  ;;  %p131_p6 = scmp.lt.s32.totalorder %s66_s13, %s66_s13 }
  0x11   :  { %27 = vmax.xlane.f32.xlu0 %v25_v2  ;;  %p127_p5 = scmp.ne.s32.totalorder %s66_s13, %s126_s14  ;;  %p132_p7 = scmp.lt.s32.totalorder %s126_s14, %s126_s14 }
  0x13   :  { %p133_p8 = por %p132_p7, %p131_p6 }
  0x15   :  { %29 = vmax.xlane.f32.xlu0 %v26_v3  ;;  %p134_p9 = pnand %p133_p8, %p127_p5 }
  0x9a   :  { %v28_v4 = vpop.xlane.xlu0 %27 }
  0x9e   :  { %v30_v5 = vpop.xlane.xlu0 %29 }
  0x9f   :  { %v31_v6 = vmax.f32 %v28_v4, %v30_v5 }
  0xa1   :  { %v32_v7 = vrot.slane %v31_v6, 4 }
  0xa3   :  { %v33_v8 = vmax.f32 %v31_v6, %v32_v7 }
  0xa5   :  { %v34_v9 = vrot.slane %v33_v8, 2 }
  0xa7   :  { %v35_v10 = vmax.f32 %v33_v8, %v34_v9 }
  0xa9   :  { %v36_v11 = vrot.slane %v35_v10, 1 }
  0xab   :  { %v37_v12 = vmax.f32 %v35_v10, %v36_v11 }
  0xad   :  { %v38_v13 = vmax.f32 %v37_v12, 1.1754944e-38 }
  0xaf   :  { %100 = vlog2.f32 %v38_v13 }
  0xbc   :  { %v101_v14 = vpop.eup %100 }
  0xbd   :  { %v40_v15 = vmul.f32 0.6931472, %v101_v14 }
  0xbf   :  { %v42_v16 = vmul.f32 1.442695, %v40_v15 }
  0xc1   :  { %v43_v17 = vceil.f32 %v42_v16 }
  0xc3   :  { %v44_v18 = vsub.f32 31.0, %v43_v17  ;;  %v77_v19 = vadd.f32 -31.0, %v43_v17 }
  0xc5   :  { %102 = vpow2.f32 %v44_v18 }
  0xc6   :  { %104 = vpow2.f32 %v77_v19 }
  0xd2   :  { %v103_v20 = vpop.eup %102 }
  0xd3   :  { %v48_v21 = vmul.f32 %v103_v20, %v23_v0  ;;  %v49_v22 = vmul.f32 %v103_v20, %v24_v1  ;;  %v105_v37 = vpop.eup %104 }
  0xd5   :  { %v78_v23 = vclamps-f32 %v48_v21, 2.1474836e+09  ;;  %v79_v24 = vclamps-f32 %v49_v22, 2.1474836e+09 }
  0xd7   :  { %v82_v25 = vcvt.f32.s32 %v78_v23  ;;  %v90_v26 = vcvt.f32.s32 %v79_v24  ;;  %v80_v28 = vand.u32 2147483647, %v78_v23  ;;  %v85_v31 = vand.u32 2147483648, %v78_v23 }
  0xd8   :  { %v88_v32 = vand.u32 2147483647, %v79_v24  ;;  %v93_v34 = vand.u32 2147483648, %v79_v24 }
  0xd9   :  { %v83_v27 = vcvt.s32.f32 %v82_v25  ;;  %v91_v29 = vcvt.s32.f32 %v90_v26  ;;  %vm81_vm0 = vcmp.lt.f32.partialorder %v80_v28, 8388608.0 }
  0xda   :  { %vm89_vm1 = vcmp.lt.f32.partialorder %v88_v32, 8388608.0 }
  0xdb   :  { %v84_v30 = vand.u32 2147483647, %v83_v27  ;;  %v92_v33 = vand.u32 2147483647, %v91_v29 }
  0xdd   :  { %v86_v35 = vor.u32 %v85_v31, %v84_v30  ;;  %v94_v36 = vor.u32 %v93_v34, %v92_v33 }
  0xdf   :  { %v87_v38 = vsel %vm81_vm0, %v86_v35, %v78_v23  ;;  %v95_v39 = vsel %vm89_vm1, %v94_v36, %v79_v24 }
  0xe0   :  { %v56_v40 = vmul.f32 %v105_v37, %v87_v38  ;;  %v57_v41 = vmul.f32 %v105_v37, %v95_v39 }
  0xe2   :  { %58 = vst [vmem:[#allocation5] sm:$0xff] %v56_v40  ;;  %59 = vst [vmem:[#allocation5 + $0x8] sm:$0xff] %v57_v41 }
  0xe3   :  { %137 = shalt.err (!%p134_p9)
}
  0xe4   :  { %71 = dma.vmem_to_hbm [thread:$0]  %s66_s13, 256, %s177_s1, [#allocation4], %s151_s9, %s151_s9, %s152_s10  }
  0xe5   :  { %148 = dma.done.wait [#allocation4], 256  }
  0xe6   :  { %149 = vsyncadd [#allocation4], 4294967040 }
  0xe7   :  { %75 = vsyncpa [#allocation3], 1 }
  0xe8   :  { %76 = vsyncpa [#allocation4], 1 }

</bundles_post_ra>
